<compile_context>
chip_gen: v7x
topology: tpu7x:2x2x1
jax: 0.10.0
libtpu: 0.0.40
codegen_flags: <defaults>
</compile_context>

<pallas_src>
import jax
import jax.numpy as jnp
from jax.experimental import pallas as pl
from jax.experimental.pallas import tpu as pltpu


_MAX_BATCH_BLOCK = 16384   # lane-dense batch-tile cap (sweep 8192-32768 in prod)
_VPU_INDIM_MAX = 32        # in_dim <= this -> broadcast-FMA layer 1 on the VPU
_MXU_HIDDEN_MIN = 128      # hidden_dim >= this -> layer 2 on the (idle) MXU


def _round_up(x, m):
    return ((x + m - 1) // m) * m


def _block_plan(batch):
    """Choose (block_b, padded_batch).

    * Batch is padded to a multiple of 128 so every x / out tile is lane-dense
      (full-width vst, no masked stores).
    * Tiles are as large as possible (per-step overhead ~0.35us + DMA issue cost
      dominate tiny tiles), capped at _MAX_BATCH_BLOCK.
    * Keep >= 2 grid blocks when the batch allows it so the "parallel" batch
      axis can be sharded across v7x's two TensorCores (no effect on v5e/v6e).
    """
    bp = _round_up(batch, 128)
    if bp <= 128:
        return bp, bp
    n_blocks = max(2, -(-bp // _MAX_BATCH_BLOCK))        # ceil-div
    block_b = _round_up(-(-bp // n_blocks), 128)
    return block_b, n_blocks * block_b


def fnn_kernel(xT_ref, w1_ref, b1_ref, w2_ref, b2_ref, o_ref):
    """One batch tile; batch lives on the lane axis so every tile is lane-dense.

    xT : (in_dim, Bt)   w1 : (H, in_dim)   b1 : (H, 1)
    w2 : (H, 1)         b2 : (1, 1)        out: (1, Bt)
    """
    in_dim = xT_ref.shape[0]
    hidden = w1_ref.shape[0]
    # Layer-1 compute dtype follows the streamed activation dtype: feed bf16 on
    # v6e/v7x (2x VALU throughput, half HBM traffic); keep f32 on v5e (no bf16
    # VALU).  Layer-2 accumulation is always f32.
    cdt = xT_ref.dtype

    w1 = w1_ref[...].astype(cdt)            # (H, in_dim)
    b1 = b1_ref[...].astype(cdt)            # (H, 1)  (dtype-hygiene fix)

    if in_dim <= _VPU_INDIM_MAX:
        # Degenerate contraction (in_dim = 2 here): broadcast FMAs on the VPU;
        # a K<=32 matmul would waste >=85% of the systolic array.
        # NOTE: a stride-0 sublane-broadcast load of row k
        # (xT_ref[pl.ds(k, hidden, stride=0), :]) would move the (1,Bt)->(H,Bt)
        # replication onto the idle vld slot; kept as a value-level broadcast
        # here for portability across current Mosaic lowerings.
        xT = xT_ref[...]                    # (in_dim, Bt)
        hT = b1 + w1[:, 0:1] * xT[0:1, :]
        for k in range(1, in_dim):
            hT = hT + w1[:, k:k + 1] * xT[k:k + 1, :]
    else:
        # Non-trivial contraction: MXU with f32 accumulation, (H, Bt) stays
        # lane-dense.
        hT = jnp.dot(w1, xT_ref[...].astype(cdt),
                     preferred_element_type=jnp.float32)
        hT = hT + b1.astype(jnp.float32)

    hT = jnp.maximum(hT, 0.0)               # ReLU, (H, Bt)

    w2 = w2_ref[...]                        # (H, 1)
    b2 = b2_ref[...].astype(jnp.float32)    # (1, 1)
    if hidden >= _MXU_HIDDEN_MIN:
        # Single-unit head on the MXU (M=1, K=H, N=Bt): the MXU slot is
        # otherwise idle while VPU mul+reduce cost grows with H.
        out = jax.lax.dot_general(
            w2.astype(hT.dtype), hT,
            dimension_numbers=(((0,), (0,)), ((), ())),
            preferred_element_type=jnp.float32) + b2
    else:
        # Small H: VPU multiply + sublane reduction, no MXU round trip.
        out = jnp.sum(hT.astype(jnp.float32) * w2.astype(jnp.float32),
                      axis=0, keepdims=True) + b2

    o_ref[...] = out.astype(o_ref.dtype)


@jax.jit
def fnn_forward_feature_major(xT, w1, b1_col, w2_col, b2_11):
    """xT: (in_dim, B) feature-major activations (no transpose HBM pass).

    Returns (B, 1), matching the torch module's output layout.
    """
    in_dim, batch = xT.shape
    hidden = w1.shape[0]
    block_b, bp = _block_plan(batch)
    if bp != batch:
        xT = jnp.pad(xT, ((0, 0), (0, bp - batch)))
    n_blocks = bp // block_b

    out = pl.pallas_call(
        fnn_kernel,
        out_shape=jax.ShapeDtypeStruct((1, bp), xT.dtype),
        grid=(n_blocks,),
        in_specs=[
            # x tile: streamed / double-buffered along the batch grid.
            # (If the xprof trace ever shows exposed DMA here, bump to
            #  pipeline_mode=pl.Buffered(3) on this spec only.)
            pl.BlockSpec((in_dim, block_b), lambda i: (0, i)),
            # Weights & biases: constant index_map -> DMA'd once, VMEM-resident.
            pl.BlockSpec((hidden, in_dim), lambda i: (0, 0)),
            pl.BlockSpec((hidden, 1), lambda i: (0, 0)),
            pl.BlockSpec((hidden, 1), lambda i: (0, 0)),
            pl.BlockSpec((1, 1), lambda i: (0, 0)),
        ],
        out_specs=pl.BlockSpec((1, block_b), lambda i: (0, i)),  # lane-dense rows
        compiler_params=pltpu.CompilerParams(
            dimension_semantics=("parallel",),      # shard batch grid on v7x
            vmem_limit_bytes=48 * 1024 * 1024,      # explicit; < v7x's 64 MiB
        ),
    )(xT, w1, b1_col, w2_col, b2_11)

    # (1, bp) -> (B, 1): contiguous, so reshape + slice are metadata-only.
    return out.reshape(bp, 1)[:batch]


@jax.jit
def fnn_forward(x, w1, b1_col, w2_col, b2_11):
    """x: (B, in_dim), same interface as the torch module.

    The x.T below is the only per-call glue (one extra HBM pass over the tiny
    activations).  Producers that can emit activations feature-major should
    call fnn_forward_feature_major directly and skip it.
    """
    return fnn_forward_feature_major(x.T, w1, b1_col, w2_col, b2_11)


def init_params(key, in_dim, hidden_dim, dtype=jnp.float32):
    """torch.nn.Linear-style init (U(+-1/sqrt(fan_in))), stored ONCE in the
    kernel layout: w1 (H, in) [torch layout], b1 (H, 1), w2 (H, 1), b2 (1, 1).
    Use dtype=jnp.bfloat16 on v6e/v7x to halve HBM traffic and double VALU
    throughput (layer-2 accumulation stays f32 inside the kernel)."""
    k1, k2, k3, k4 = jax.random.split(key, 4)
    bound1 = 1.0 / jnp.sqrt(in_dim)
    bound2 = 1.0 / jnp.sqrt(hidden_dim)
    w1 = jax.random.uniform(k1, (hidden_dim, in_dim), jnp.float32, -bound1, bound1)
    b1 = jax.random.uniform(k2, (hidden_dim, 1), jnp.float32, -bound1, bound1)
    w2 = jax.random.uniform(k3, (hidden_dim, 1), jnp.float32, -bound2, bound2)
    b2 = jax.random.uniform(k4, (1, 1), jnp.float32, -bound2, bound2)
    return (w1.astype(dtype), b1.astype(dtype),
            w2.astype(dtype), b2.astype(dtype))


if __name__ == "__main__":
    in_dim = 2
    hidden_dim = 32
    batch = 8

    key = jax.random.PRNGKey(0)
    kx, kp = jax.random.split(key)
    x = jax.random.normal(kx, (batch, in_dim), jnp.float32)
    w1, b1_col, w2_col, b2_11 = init_params(kp, in_dim, hidden_dim)

    out = fnn_forward(x, w1, b1_col, w2_col, b2_11)
    out = jax.block_until_ready(out)

    # Pure-JAX reference, same math as the PyTorch module.
    ref = jnp.maximum(x @ w1.T + b1_col[:, 0], 0.0) @ w2_col + b2_11
    assert out.shape == (batch, 1)
    assert jnp.allclose(out, ref, atol=1e-5, rtol=1e-5)

    print("KERNEL_OK")
</pallas_src>

<mosaic_0001>
module attributes {stable_mosaic.version = 11 : i64} {
  func.func @fnn_kernel(%arg0: i32, %arg1: memref<2x128xf32, #tpu.memory_space<vmem>>, %arg2: memref<32x2xf32, #tpu.memory_space<vmem>>, %arg3: memref<32x1xf32, #tpu.memory_space<vmem>>, %arg4: memref<32x1xf32, #tpu.memory_space<vmem>>, %arg5: memref<1x1xf32, #tpu.memory_space<vmem>>, %arg6: memref<1x128xf32, #tpu.memory_space<vmem>>) attributes {dimension_semantics = [#tpu.dimension_semantics<parallel>], iteration_bounds = array<i64: 1>, scalar_prefetch = 0 : i64, scratch_operands = 0 : i64, tpu.core_type = #tpu.core_type<tc>, window_params = [{transform_indices = @transform_0, window_bounds = array<i64: 2, 128>}, {pipeline_mode = #tpu.pipeline_mode<synchronous>, transform_indices = @transform_1, window_bounds = array<i64: 32, 2>}, {pipeline_mode = #tpu.pipeline_mode<synchronous>, transform_indices = @transform_2, window_bounds = array<i64: 32, 1>}, {pipeline_mode = #tpu.pipeline_mode<synchronous>, transform_indices = @transform_3, window_bounds = array<i64: 32, 1>}, {pipeline_mode = #tpu.pipeline_mode<synchronous>, transform_indices = @transform_4, window_bounds = array<i64: 1, 1>}, {transform_indices = @transform_5, window_bounds = array<i64: 1, 128>}]} {
    %c0 = arith.constant 0 : index
    %c0_0 = arith.constant 0 : index
    %0 = vector.load %arg2[%c0, %c0_0] : memref<32x2xf32, #tpu.memory_space<vmem>>, vector<32x2xf32>
    %c0_1 = arith.constant 0 : index
    %c0_2 = arith.constant 0 : index
    %1 = vector.load %arg3[%c0_1, %c0_2] : memref<32x1xf32, #tpu.memory_space<vmem>>, vector<32x1xf32>
    %c0_3 = arith.constant 0 : index
    %c0_4 = arith.constant 0 : index
    %2 = vector.load %arg1[%c0_3, %c0_4] : memref<2x128xf32, #tpu.memory_space<vmem>>, vector<2x128xf32>
    %3 = vector.extract_strided_slice %0 {offsets = [0, 0], sizes = [32, 1], strides = [1, 1]} : vector<32x2xf32> to vector<32x1xf32>
    %4 = vector.extract_strided_slice %2 {offsets = [0, 0], sizes = [1, 128], strides = [1, 1]} : vector<2x128xf32> to vector<1x128xf32>
    %5 = vector.broadcast %3 : vector<32x1xf32> to vector<32x128xf32>
    %6 = vector.broadcast %4 : vector<1x128xf32> to vector<32x128xf32>
    %7 = arith.mulf %5, %6 : vector<32x128xf32>
    %8 = vector.broadcast %1 : vector<32x1xf32> to vector<32x128xf32>
    %9 = arith.addf %8, %7 : vector<32x128xf32>
    %10 = vector.extract_strided_slice %0 {offsets = [0, 1], sizes = [32, 1], strides = [1, 1]} : vector<32x2xf32> to vector<32x1xf32>
    %11 = vector.extract_strided_slice %2 {offsets = [1, 0], sizes = [1, 128], strides = [1, 1]} : vector<2x128xf32> to vector<1x128xf32>
    %12 = vector.broadcast %10 : vector<32x1xf32> to vector<32x128xf32>
    %13 = vector.broadcast %11 : vector<1x128xf32> to vector<32x128xf32>
    %14 = arith.mulf %12, %13 : vector<32x128xf32>
    %15 = arith.addf %9, %14 : vector<32x128xf32>
    %cst = arith.constant 0.000000e+00 : f32
    %16 = vector.broadcast %cst : f32 to vector<32x128xf32>
    %17 = arith.maximumf %15, %16 : vector<32x128xf32>
    %c0_5 = arith.constant 0 : index
    %c0_6 = arith.constant 0 : index
    %18 = vector.load %arg4[%c0_5, %c0_6] : memref<32x1xf32, #tpu.memory_space<vmem>>, vector<32x1xf32>
    %c0_7 = arith.constant 0 : index
    %c0_8 = arith.constant 0 : index
    %19 = vector.load %arg5[%c0_7, %c0_8] : memref<1x1xf32, #tpu.memory_space<vmem>>, vector<1x1xf32>
    %20 = vector.broadcast %18 : vector<32x1xf32> to vector<32x128xf32>
    %21 = arith.mulf %17, %20 : vector<32x128xf32>
    %cst_9 = arith.constant dense<0.000000e+00> : vector<128xf32>
    %22 = vector.multi_reduction <add>, %21, %cst_9 [0] : vector<32x128xf32> to vector<128xf32>
    %23 = vector.shape_cast %22 : vector<128xf32> to vector<1x128xf32>
    %24 = vector.broadcast %19 : vector<1x1xf32> to vector<1x128xf32>
    %25 = arith.addf %23, %24 : vector<1x128xf32>
    %c0_10 = arith.constant 0 : index
    %c0_11 = arith.constant 0 : index
    %26 = vector.load %arg6[%c0_10, %c0_11] : memref<1x128xf32, #tpu.memory_space<vmem>>, vector<1x128xf32>
    tpu.vector_store %arg6[%c0_10, %c0_11], %25 {strides = array<i32>} : memref<1x128xf32, #tpu.memory_space<vmem>>, vector<1x128xf32>,
    return
  }
  func.func @transform_0(%arg0: i32) -> (i32, i32) {
    %c0_i32 = arith.constant 0 : i32
    %c0_i32_0 = arith.constant 0 : i32
    return %c0_i32, %arg0 : i32, i32
  }
  func.func @transform_1(%arg0: i32) -> (i32, i32) {
    %c0_i32 = arith.constant 0 : i32
    %c0_i32_0 = arith.constant 0 : i32
    %c0_i32_1 = arith.constant 0 : i32
    return %c0_i32, %c0_i32_0 : i32, i32
  }
  func.func @transform_2(%arg0: i32) -> (i32, i32) {
    %c0_i32 = arith.constant 0 : i32
    %c0_i32_0 = arith.constant 0 : i32
    %c0_i32_1 = arith.constant 0 : i32
    return %c0_i32, %c0_i32_0 : i32, i32
  }
  func.func @transform_3(%arg0: i32) -> (i32, i32) {
    %c0_i32 = arith.constant 0 : i32
    %c0_i32_0 = arith.constant 0 : i32
    %c0_i32_1 = arith.constant 0 : i32
    return %c0_i32, %c0_i32_0 : i32, i32
  }
  func.func @transform_4(%arg0: i32) -> (i32, i32) {
    %c0_i32 = arith.constant 0 : i32
    %c0_i32_0 = arith.constant 0 : i32
    %c0_i32_1 = arith.constant 0 : i32
    return %c0_i32, %c0_i32_0 : i32, i32
  }
  func.func @transform_5(%arg0: i32) -> (i32, i32) {
    %c0_i32 = arith.constant 0 : i32
    %c0_i32_0 = arith.constant 0 : i32
    return %c0_i32, %arg0 : i32, i32
  }
}

</mosaic_0001>

<bundles_post_ra>
// kernel: fnn_forward_feature_major.1
= control target key start
LH: loop header
LB: loop body
LE: loop exit
PB: predicated region body
PF: predicated region fallthrough
CT: control target
= control target key end

     0   :  { %v176_v0 = vmov 0   ;;  %v177_v7 = vmov 1   ;;  %v51_v18 = vlaneseq  ;;  %s253_s1 = inlined_call_operand.vmem [shape: f32[32,2], index: 1, kind: input, shape index: {}]   ;;  %s254_s2 = inlined_call_operand.vmem [shape: f32[32,1], index: 2, kind: input, shape index: {}]   ;;  %s255_s4 = inlined_call_operand.<no memory space> [shape: f32[1,1], index: 4, kind: input, shape index: {}]   ;;  %s256_s3 = inlined_call_operand.vmem [shape: f32[32,1], index: 3, kind: input, shape index: {}]   ;;  %s257_s0 = inlined_call_operand.vmem [shape: f32[2,128], index: 0, kind: input, shape index: {}]   ;;  %s258_s5 = inlined_call_operand.vmem [shape: f32[1,128], index: 5, kind: output, shape index: {}]  }
   0x1   :  { %171 = vset.pattern.permute.xlu1 %v176_v0  ;;  %170 = vset.pattern.permute.xlu0 %v176_v0  ;;  %v24_v1 = vld [vmem:[%s253_s1 + $0x10] sm:$0xff]  ;;  %v22_v2 = vld [vmem:[%s253_s1] sm:$0xff]  ;;  %v10_v3 = vstv %s255_s4  ;;  %v23_v5 = vld [vmem:[%s253_s1 + $0x8] sm:$0xff] }
   0x2   :  { %43 = vperm.xlu1 %171, %v24_v1   ;;  %33 = vperm.xlu0 %170, %v22_v2   ;;  %11 = vst [vmem:[#allocation2] sm:$0x1] %v10_v3  ;;  %v26_v4 = vld [vmem:[%s254_s2] sm:$0xff]  ;;  %v27_v6 = vld [vmem:[%s254_s2 + $0x8] sm:$0xff]  ;;  %v25_v8 = vld [vmem:[%s253_s1 + $0x18] sm:$0xff]  ;;  %v52_v21 = vshrl.u32 %v51_v18, 7 }
   0x3   :  { %v28_v9 = vld [vmem:[%s254_s2 + $0x10] sm:$0xff]  ;;  %v29_v10 = vld [vmem:[%s254_s2 + $0x18] sm:$0xff]  ;;  %v115_v11 = vld [vmem:[%s256_s3] sm:$0xff] }
   0x4   :  { %v116_v12 = vld [vmem:[%s256_s3 + $0x8] sm:$0xff]  ;;  %v117_v13 = vld [vmem:[%s256_s3 + $0x10] sm:$0xff]  ;;  %v118_v15 = vld [vmem:[%s256_s3 + $0x18] sm:$0xff]  ;;  %v53_v24 = vsub.s32 0, %v52_v21  ;;  %v101_v25 = vsub.s32 1, %v52_v21 }
   0x5   :  { %v30_v26 = vld [vmem:[%s257_s0] sm:$0x3] }
   0x6   :  { %61 = vperm.xlu1 %171, %v26_v4   ;;  %38 = vperm.xlu0 %170, %v23_v5   ;;  %v54_v29 = vrot.slane %v30_v26, %v53_v24  ;;  %v102_v30 = vrot.slane %v30_v26, %v101_v25 }
   0x9   :  { %v119_v14 = vld [vmem:[#allocation2] sm:$0x1] }
   0xa   :  { %172 = vset.pattern.permute.xlu1 %v177_v7  ;;  %66 = vperm.xlu0 %170, %v27_v6  }
   0xb   :  { %84 = vperm.xlu1 %172, %v22_v2  }
   0xe   :  { %173 = vset.pattern.permute.xlu0 %v177_v7 }
   0xf   :  { %174 = vset.pattern.permute.xlu1 %v176_v0  ;;  %88 = vperm.xlu0 %173, %v23_v5  }
  0x10   :  { %48 = vperm.xlu1 %174, %v25_v8  }
  0x13   :  { %92 = vperm.xlu0 %173, %v24_v1  }
  0x14   :  { %71 = vperm.xlu1 %174, %v28_v9  }
  0x17   :  { %96 = vperm.xlu0 %173, %v25_v8  }
  0x18   :  { %76 = vperm.xlu1 %174, %v29_v10  }
  0x1b   :  { %175 = vset.pattern.permute.xlu0 %v176_v0 }
  0x1c   :  { %122 = vperm.xlu1 %174, %v115_v11   ;;  %127 = vperm.xlu0 %175, %v116_v12  }
  0x20   :  { %132 = vperm.xlu1 %174, %v117_v13   ;;  %155 = vperm.xlu0 %175, %v119_v14  }
  0x24   :  { %137 = vperm.xlu1 %174, %v118_v15  }
  0x81   :  { %v44_v16 = vpop.permute.xlu1 %43  ;;  %v34_v17 = vpop.permute.xlu0 %33 }
  0x82   :  { %v55_v31 = vmul.f32 %v54_v29, %v34_v17  ;;  %v57_v34 = vmul.f32 %v54_v29, %v44_v16 }
  0x85   :  { %v62_v19 = vpop.permute.xlu1 %61  ;;  %v39_v20 = vpop.permute.xlu0 %38 }
  0x86   :  { %v56_v35 = vmul.f32 %v54_v29, %v39_v20  ;;  %v79_v38 = vadd.f32 %v62_v19, %v55_v31 }
  0x89   :  { %v67_v22 = vpop.permute.xlu0 %66 }
  0x8a   :  { %v85_v23 = vpop.permute.xlu1 %84  ;;  %v80_v39 = vadd.f32 %v67_v22, %v56_v35 }
  0x8b   :  { %v103_v36 = vmul.f32 %v102_v30, %v85_v23 }
  0x8d   :  { %v107_v44 = vadd.f32 %v103_v36, %v79_v38 }
  0x8e   :  { %v89_v27 = vpop.permute.xlu0 %88 }
  0x8f   :  { %v49_v28 = vpop.permute.xlu1 %48  ;;  %v104_v37 = vmul.f32 %v102_v30, %v89_v27  ;;  %v111_v52 = vmax.f32 %v107_v44, 0.0 }
  0x90   :  { %v58_v46 = vmul.f32 %v54_v29, %v49_v28 }
  0x91   :  { %v108_v45 = vadd.f32 %v104_v37, %v80_v39 }
  0x92   :  { %v93_v32 = vpop.permute.xlu0 %92 }
  0x93   :  { %v72_v33 = vpop.permute.xlu1 %71  ;;  %v105_v40 = vmul.f32 %v102_v30, %v93_v32  ;;  %v112_v53 = vmax.f32 %v108_v45, 0.0 }
  0x94   :  { %v81_v41 = vadd.f32 %v72_v33, %v57_v34 }
  0x96   :  { %v97_v42 = vpop.permute.xlu0 %96  ;;  %v109_v47 = vadd.f32 %v105_v40, %v81_v41 }
  0x97   :  { %v77_v43 = vpop.permute.xlu1 %76  ;;  %v106_v48 = vmul.f32 %v102_v30, %v97_v42 }
  0x98   :  { %v82_v49 = vadd.f32 %v77_v43, %v58_v46  ;;  %v113_v57 = vmax.f32 %v109_v47, 0.0 }
  0x9a   :  { %v110_v54 = vadd.f32 %v106_v48, %v82_v49 }
  0x9b   :  { %v123_v50 = vpop.permute.xlu1 %122  ;;  %v128_v51 = vpop.permute.xlu0 %127 }
  0x9c   :  { %v140_v55 = vmul.f32 %v123_v50, %v111_v52  ;;  %v141_v56 = vmul.f32 %v128_v51, %v112_v53  ;;  %v114_v61 = vmax.f32 %v110_v54, 0.0 }
  0x9e   :  { %v144_v60 = vadd.f32 %v141_v56, %v140_v55 }
  0x9f   :  { %v133_v58 = vpop.permute.xlu1 %132  ;;  %v156_v6 = vpop.permute.xlu0 %155 }
  0xa0   :  { %v142_v59 = vmul.f32 %v133_v58, %v113_v57  ;;  %v161_v8 = vrot.slane %v156_v6, %v53_v24 }
  0xa2   :  { %v145_v63 = vadd.f32 %v144_v60, %v142_v59 }
  0xa3   :  { %v138_v62 = vpop.permute.xlu1 %137 }
  0xa4   :  { %v143_v0 = vmul.f32 %v138_v62, %v114_v61 }
  0xa6   :  { %v146_v1 = vadd.f32 %v145_v63, %v143_v0 }
  0xa8   :  { %v147_v2 = vrot.slane %v146_v1, 4 }
  0xaa   :  { %v148_v3 = vadd.f32 %v147_v2, %v146_v1 }
  0xac   :  { %v149_v4 = vrot.slane %v148_v3, 2 }
  0xae   :  { %v150_v5 = vadd.f32 %v149_v4, %v148_v3 }
  0xb0   :  { %v151_v7 = vrot.slane %v150_v5, 1 }
  0xb2   :  { %v152_v9 = vadd.f32 %v151_v7, %v150_v5 }
  0xb4   :  { %v162_v10 = vadd.f32 %v161_v8, %v152_v9 }
  0xb6   :  { %163 = vst [vmem:[%s258_s5] sm:$0x1] %v162_v10 }

</bundles_post_ra>
